<compile_context>
chip_gen: v7x
topology: tpu7x:2x2x1
jax: 0.10.0
libtpu: 0.0.40
codegen_flags: <defaults>
</compile_context>

<pallas_src>
import jax
import jax.numpy as jnp
from jax import lax
from jax.experimental import pallas as pl
from jax.experimental.pallas import tpu as pltpu


def _round_up(x, m):
    return ((x + m - 1) // m) * m


def _cdiv(a, b):
    return (a + b - 1) // b


def _vmem_capacity_bytes():
    """Physical VMEM per core; conservative fallback if the query is unavailable."""
    try:
        return int(pltpu.get_tpu_info().vmem_capacity_bytes)
    except Exception:
        return 64 * 1024 * 1024  # v7x per-TC size: safe lower bound everywhere


# ----------------------------------------------------------------------------
# Kernel body
# ----------------------------------------------------------------------------
def _make_kernel(layer_num: int, use_rank1: bool, acc_is_output: bool):
    """Build the kernel.

    use_rank1:      weights arrive as (L, D, D) rank-1 matrices -> MXU matmul
                    realizes both the row-dot and its lane broadcast.
    acc_is_output:  accumulate directly in o_ref (f32 outputs only).
    """

    def run_layers(x_ref, w_ref, b_ref, acc_ref):
        acc_ref[...] = x_ref[...].astype(acc_ref.dtype)

        def layer(i):
            x0 = x_ref[...].astype(jnp.float32)                 # re-read: vld is cheap
            xl = acc_ref[...].astype(jnp.float32)
            b = b_ref[pl.ds(i, 1), :].astype(jnp.float32)       # (1, D)
            if use_rank1:
                # (tile_b, D) @ (D, D) with W_i = w_i . 1^T  ->  every column is s.
                s_b = jnp.dot(xl, w_ref[i].astype(jnp.float32),
                              preferred_element_type=jnp.float32)
            else:
                w = w_ref[pl.ds(i, 1), :].astype(jnp.float32)   # (1, D)
                s_b = jnp.sum(xl * w, axis=1, keepdims=True)    # (tile_b, 1)
            acc_ref[...] = (x0 * s_b + b + xl).astype(acc_ref.dtype)

        if layer_num <= 16:
            for i in range(layer_num):                          # full unroll, small L
                layer(i)
        else:
            def body(i, carry):                                 # bounded live ranges
                layer(i)
                return carry
            lax.fori_loop(0, layer_num, body, 0, unroll=2)

    if acc_is_output:
        def kernel(x_ref, w_ref, b_ref, o_ref):
            run_layers(x_ref, w_ref, b_ref, o_ref)
    else:
        def kernel(x_ref, w_ref, b_ref, o_ref, acc_ref):
            run_layers(x_ref, w_ref, b_ref, acc_ref)
            o_ref[...] = acc_ref[...].astype(o_ref.dtype)
    return kernel


# ----------------------------------------------------------------------------
# Wrapper
# ----------------------------------------------------------------------------
def crossnet_forward(x, kernels, bias, *, tile_b=None):
    """x: (B, D); kernels, bias: (L, D)  ->  (B, D). Matches PyTorch 'vector' path."""
    B, D = x.shape
    L, Dk = kernels.shape
    assert Dk == D and bias.shape == (L, D)

    cap = _vmem_capacity_bytes()
    budget = cap // 2                      # for tile-sized buffers
    vmem_limit = int(cap * 0.7)            # scoped limit handed to Mosaic

    out_dtype = x.dtype
    acc_is_output = out_dtype == jnp.float32
    x_bytes = x.dtype.itemsize
    o_bytes = jnp.dtype(out_dtype).itemsize
    w_bytes = kernels.dtype.itemsize
    b_bytes = bias.dtype.itemsize

    # Rank-1 MXU path only when the (L, D, D) matrices comfortably fit in VMEM.
    rank1_bytes = L * D * D * w_bytes
    use_rank1 = (D >= 128) and (rank1_bytes <= min(budget // 4, 8 * 1024 * 1024))
    weight_hbm = (rank1_bytes if use_rank1 else L * D * w_bytes) + L * D * b_bytes
    weight_footprint = 2 * weight_hbm      # assume double-buffered allocation

    sub = max(8, 32 // min(x_bytes, o_bytes))   # sublane granularity (f32: 8, bf16: 16)
    if tile_b is None:
        # Live tile-sized buffers: 2x input + 2x output (+ f32 scratch if needed).
        per_row = D * (2 * x_bytes + 2 * o_bytes + (0 if acc_is_output else 4))
        avail = max(budget - weight_footprint, per_row * sub)
        max_rows = min((avail // per_row) // sub * sub, 4096)
        max_rows = max(max_rows, sub)
        B_sub = _round_up(B, sub)
        # Keep >= ~4 grid steps for large batches so the "parallel" batch axis
        # can shard across v7x's two TensorCores; tiny batches stay single-step.
        desired_steps = max(1, min(4, B_sub // 512))
        steps = max(_cdiv(B_sub, max_rows), desired_steps)
        tile_b = _round_up(_cdiv(B_sub, steps), sub)
    else:
        assert tile_b >= sub and tile_b % sub == 0, (
            f"tile_b must be a positive multiple of {sub}")

    grid_steps = _cdiv(B, tile_b)
    B_pad = grid_steps * tile_b
    x_in = x if B_pad == B else jnp.pad(x, ((0, B_pad - B), (0, 0)))

    if use_rank1:
        # W_i = w_i . 1^T  ->  (x_l @ W_i)[b, e] = <x_l[b], w_i> for every e.
        w_arg = jnp.broadcast_to(kernels[:, :, None], (L, D, D))
        w_spec = pl.BlockSpec((L, D, D), lambda i: (0, 0, 0))
        flops = 2 * B_pad * D * D * L
    else:
        w_arg = kernels
        w_spec = pl.BlockSpec((L, D), lambda i: (0, 0))
        flops = 4 * B_pad * D * L

    cost = pl.CostEstimate(
        flops=int(flops),
        transcendentals=0,
        bytes_accessed=int(B_pad * D * (x_bytes + o_bytes) + weight_hbm),
    )

    scratch = () if acc_is_output else (pltpu.VMEM((tile_b, D), jnp.float32),)

    out = pl.pallas_call(
        _make_kernel(L, use_rank1, acc_is_output),
        out_shape=jax.ShapeDtypeStruct((B_pad, D), out_dtype),
        grid_spec=pltpu.PrefetchScalarGridSpec(
            num_scalar_prefetch=0,
            grid=(grid_steps,),
            in_specs=[
                pl.BlockSpec((tile_b, D), lambda i: (i, 0)),   # x tile
                w_spec,                                        # kernels (resident)
                pl.BlockSpec((L, D), lambda i: (0, 0)),        # biases (resident)
            ],
            out_specs=pl.BlockSpec((tile_b, D), lambda i: (i, 0)),
            scratch_shapes=scratch,
        ),
        compiler_params=pltpu.CompilerParams(
            dimension_semantics=("parallel",),
            vmem_limit_bytes=vmem_limit,
        ),
        cost_estimate=cost,
    )(x_in, w_arg, bias)

    return out if B_pad == B else out[:B]


# ----------------------------------------------------------------------------
# Pure-JAX reference (the PyTorch unsqueeze/tensordot/matmul/squeeze collapses
# to a row-wise dot product followed by a rank-1 update)
# ----------------------------------------------------------------------------
def crossnet_reference(x, kernels, bias):
    x0 = x
    xl = x0
    for i in range(kernels.shape[0]):
        s = jnp.sum(xl * kernels[i][None, :], axis=-1, keepdims=True)
        xl = x0 * s + bias[i][None, :] + xl
    return xl


# ----------------------------------------------------------------------------
# Demo / self-test
# ----------------------------------------------------------------------------
def _run_case(key, B, D, L, dtype=jnp.float32, tile_b=None, rtol=1e-4, atol=1e-4):
    kx, kw = jax.random.split(key)
    x = jax.random.normal(kx, (B, D), dtype=jnp.float32).astype(dtype)
    # Mirror nn.init.xavier_normal_ on (D, 1) slices: std = sqrt(2 / (D + 1)); zero bias.
    xavier_std = (2.0 / (D + 1)) ** 0.5
    kernels = jax.random.normal(kw, (L, D), dtype=jnp.float32) * xavier_std
    bias = jnp.zeros((L, D), dtype=jnp.float32)

    out = crossnet_forward(x, kernels, bias, tile_b=tile_b)
    out = jax.block_until_ready(out)
    ref = crossnet_reference(x.astype(jnp.float32), kernels, bias)

    assert out.shape == (B, D) and out.dtype == dtype
    assert jnp.allclose(out.astype(jnp.float32), ref, atol=atol, rtol=rtol), (
        f"mismatch vs reference at B={B}, D={D}, L={L}, dtype={dtype}")


if __name__ == "__main__":
    key = jax.random.PRNGKey(0)
    k1, k2, k3 = jax.random.split(key, 3)

    # Case 1: module-default small shape; D < 128 -> VPU sum path, acc in o_ref.
    _run_case(k1, B=8, D=32, L=2)

    # Case 2: D >= 128 -> rank-1 MXU path, multi-step grid with batch padding.
    _run_case(k2, B=130, D=256, L=3, tile_b=64)

    # Case 3: bf16 I/O -> f32 VMEM scratch accumulator path (looser tolerance
    # because the only divergence from the f32 reference is the final downcast).
    _run_case(k3, B=64, D=128, L=2, dtype=jnp.bfloat16, rtol=2e-2, atol=2e-2)

    print("KERNEL_OK")
</pallas_src>

<mosaic_0001>
module attributes {stable_mosaic.version = 11 : i64} {
  func.func @kernel(%arg0: i32, %arg1: memref<8x32xf32, #tpu.memory_space<vmem>>, %arg2: memref<2x32xf32, #tpu.memory_space<vmem>>, %arg3: memref<2x32xf32, #tpu.memory_space<vmem>>, %arg4: memref<8x32xf32, #tpu.memory_space<vmem>>) attributes {dimension_semantics = [#tpu.dimension_semantics<parallel>], iteration_bounds = array<i64: 1>, scalar_prefetch = 0 : i64, scratch_operands = 0 : i64, tpu.core_type = #tpu.core_type<tc>, window_params = [{transform_indices = @transform_0, window_bounds = array<i64: 8, 32>}, {pipeline_mode = #tpu.pipeline_mode<synchronous>, transform_indices = @transform_1, window_bounds = array<i64: 2, 32>}, {pipeline_mode = #tpu.pipeline_mode<synchronous>, transform_indices = @transform_2, window_bounds = array<i64: 2, 32>}, {transform_indices = @transform_3, window_bounds = array<i64: 8, 32>}]} {
    %c0 = arith.constant 0 : index
    %c0_0 = arith.constant 0 : index
    %0 = vector.load %arg1[%c0, %c0_0] : memref<8x32xf32, #tpu.memory_space<vmem>>, vector<8x32xf32>
    %c0_1 = arith.constant 0 : index
    %c0_2 = arith.constant 0 : index
    %1 = vector.load %arg4[%c0_1, %c0_2] : memref<8x32xf32, #tpu.memory_space<vmem>>, vector<8x32xf32>
    tpu.vector_store %arg4[%c0_1, %c0_2], %0 {strides = array<i32>} : memref<8x32xf32, #tpu.memory_space<vmem>>, vector<8x32xf32>,
    %c0_3 = arith.constant 0 : index
    %c0_4 = arith.constant 0 : index
    %2 = vector.load %arg1[%c0_3, %c0_4] : memref<8x32xf32, #tpu.memory_space<vmem>>, vector<8x32xf32>
    %c0_5 = arith.constant 0 : index
    %c0_6 = arith.constant 0 : index
    %3 = vector.load %arg4[%c0_5, %c0_6] : memref<8x32xf32, #tpu.memory_space<vmem>>, vector<8x32xf32>
    %c0_7 = arith.constant 0 : index
    %c0_8 = arith.constant 0 : index
    %4 = vector.load %arg3[%c0_7, %c0_8] : memref<2x32xf32, #tpu.memory_space<vmem>>, vector<1x32xf32>
    %c0_9 = arith.constant 0 : index
    %c0_10 = arith.constant 0 : index
    %5 = vector.load %arg2[%c0_9, %c0_10] : memref<2x32xf32, #tpu.memory_space<vmem>>, vector<1x32xf32>
    %6 = vector.broadcast %5 : vector<1x32xf32> to vector<8x32xf32>
    %7 = arith.mulf %3, %6 : vector<8x32xf32>
    %cst = arith.constant dense<0.000000e+00> : vector<8xf32>
    %8 = vector.multi_reduction <add>, %7, %cst [1] : vector<8x32xf32> to vector<8xf32>
    %9 = vector.shape_cast %8 : vector<8xf32> to vector<8x1xf32>
    %10 = vector.broadcast %9 : vector<8x1xf32> to vector<8x32xf32>
    %11 = arith.mulf %2, %10 : vector<8x32xf32>
    %12 = vector.broadcast %4 : vector<1x32xf32> to vector<8x32xf32>
    %13 = arith.addf %11, %12 : vector<8x32xf32>
    %14 = arith.addf %13, %3 : vector<8x32xf32>
    %c0_11 = arith.constant 0 : index
    %c0_12 = arith.constant 0 : index
    %15 = vector.load %arg4[%c0_11, %c0_12] : memref<8x32xf32, #tpu.memory_space<vmem>>, vector<8x32xf32>
    tpu.vector_store %arg4[%c0_11, %c0_12], %14 {strides = array<i32>} : memref<8x32xf32, #tpu.memory_space<vmem>>, vector<8x32xf32>,
    %c0_13 = arith.constant 0 : index
    %c0_14 = arith.constant 0 : index
    %16 = vector.load %arg1[%c0_13, %c0_14] : memref<8x32xf32, #tpu.memory_space<vmem>>, vector<8x32xf32>
    %c0_15 = arith.constant 0 : index
    %c0_16 = arith.constant 0 : index
    %17 = vector.load %arg4[%c0_15, %c0_16] : memref<8x32xf32, #tpu.memory_space<vmem>>, vector<8x32xf32>
    %c1 = arith.constant 1 : index
    %c0_17 = arith.constant 0 : index
    %18 = vector.load %arg3[%c1, %c0_17] : memref<2x32xf32, #tpu.memory_space<vmem>>, vector<1x32xf32>
    %c1_18 = arith.constant 1 : index
    %c0_19 = arith.constant 0 : index
    %19 = vector.load %arg2[%c1_18, %c0_19] : memref<2x32xf32, #tpu.memory_space<vmem>>, vector<1x32xf32>
    %20 = vector.broadcast %19 : vector<1x32xf32> to vector<8x32xf32>
    %21 = arith.mulf %17, %20 : vector<8x32xf32>
    %cst_20 = arith.constant dense<0.000000e+00> : vector<8xf32>
    %22 = vector.multi_reduction <add>, %21, %cst_20 [1] : vector<8x32xf32> to vector<8xf32>
    %23 = vector.shape_cast %22 : vector<8xf32> to vector<8x1xf32>
    %24 = vector.broadcast %23 : vector<8x1xf32> to vector<8x32xf32>
    %25 = arith.mulf %16, %24 : vector<8x32xf32>
    %26 = vector.broadcast %18 : vector<1x32xf32> to vector<8x32xf32>
    %27 = arith.addf %25, %26 : vector<8x32xf32>
    %28 = arith.addf %27, %17 : vector<8x32xf32>
    %c0_21 = arith.constant 0 : index
    %c0_22 = arith.constant 0 : index
    %29 = vector.load %arg4[%c0_21, %c0_22] : memref<8x32xf32, #tpu.memory_space<vmem>>, vector<8x32xf32>
    tpu.vector_store %arg4[%c0_21, %c0_22], %28 {strides = array<i32>} : memref<8x32xf32, #tpu.memory_space<vmem>>, vector<8x32xf32>,
    return
  }
  func.func @transform_0(%arg0: i32) -> (i32, i32) {
    %c0_i32 = arith.constant 0 : i32
    %c0_i32_0 = arith.constant 0 : i32
    return %arg0, %c0_i32 : i32, i32
  }
  func.func @transform_1(%arg0: i32) -> (i32, i32) {
    %c0_i32 = arith.constant 0 : i32
    %c0_i32_0 = arith.constant 0 : i32
    %c0_i32_1 = arith.constant 0 : i32
    return %c0_i32, %c0_i32_0 : i32, i32
  }
  func.func @transform_2(%arg0: i32) -> (i32, i32) {
    %c0_i32 = arith.constant 0 : i32
    %c0_i32_0 = arith.constant 0 : i32
    %c0_i32_1 = arith.constant 0 : i32
    return %c0_i32, %c0_i32_0 : i32, i32
  }
  func.func @transform_3(%arg0: i32) -> (i32, i32) {
    %c0_i32 = arith.constant 0 : i32
    %c0_i32_0 = arith.constant 0 : i32
    return %arg0, %c0_i32 : i32, i32
  }
}

</mosaic_0001>

<bundles_post_ra>
// kernel: tpu_custom_call.1
= control target key start
LH: loop header
LB: loop body
LE: loop exit
PB: predicated region body
PF: predicated region fallthrough
CT: control target
= control target key end

     0   :  { %8 = vsyncpa [#allocation3], 0  ;;  %s202_s0 = inlined_call_operand.hbm [shape: f32[8,32], index: 0, kind: input, shape index: {}]   ;;  %s203_s1 = inlined_call_operand.vmem [shape: f32[2,32], index: 1, kind: input, shape index: {}]   ;;  %s204_s2 = inlined_call_operand.vmem [shape: f32[2,32], index: 2, kind: input, shape index: {}]   ;;  %s205_s3 = inlined_call_operand.hbm [shape: f32[8,32], index: 3, kind: output, shape index: {}]  }
   0x1   :  { %9 = vsyncpa [#allocation4], 0  ;;  %s139_s12 = smov [#allocation2]   ;;  %s91_s16 = scalar_lea.hbm %s202_s0, 128 }
   0x2   :  { %s16_s13 = sshll.u32 %s139_s12, 4  ;;  %p92_p0 = scmp.ne.s32.totalorder %s202_s0, %s91_s16  ;;  %s17_s13 = int_to_ptr.vmem [resolvable:$true] %s16_s13 }
   0x3   :  { %p95_p1 = scmp.lt.u32.totalorder %s91_s16, %s202_s0 }
   0x5   :  { %p97_p2 = pnand %p95_p1, %p92_p0 }
   0x7   :  { %100 = shalt.err (!%p97_p2)
}
   0x8   :  { %s101_s21 = scalar_lea.vmem %s17_s13, 128  ;;  %p106_p4 = scmp.lt.s32.totalorder %s17_s13, %s17_s13 }
   0x9   :  { %p102_p3 = scmp.ne.s32.totalorder %s17_s13, %s101_s21  ;;  %p107_p5 = scmp.lt.s32.totalorder %s101_s21, %s101_s21 }
   0xb   :  { %p108_p6 = por %p107_p5, %p106_p4 }
   0xd   :  { %p109_p7 = pnand %p108_p6, %p102_p3 }
   0xf   :  { %112 = shalt.err (!%p109_p7)
}
  0x10   :  { %19 = dma.hbm_to_vmem [thread:$0]  %s202_s0, 128, %s17_s13, [#allocation3]  }
  0x11   :  { %135 = dma.done.wait [#allocation3], 128  }
  0x12   :  { %136 = vsyncadd [#allocation3], 4294967168  ;;  %vm28_vm0 = vcmask 261120   ;;  %v27_v0 = vld [vmem:[#allocation2] sm:$0xff]  ;;  %s140_s4 = smov [#allocation5]  }
  0x13   :  { %29 = vst.msk [vmem:[#allocation5] sm:$0xff] %vm28_vm0, %v27_v0  ;;  %v85_v1 = vld [vmem:[%s203_s1] ss:$0 sm:$0xff]  ;;  %v87_v10 = vld [vmem:[%s203_s1 + $0x1] ss:$0 sm:$0xff]  ;;  %s76_s5 = sshll.u32 %s140_s4, 4  ;;  %s77_s5 = int_to_ptr.vmem [resolvable:$true] %s76_s5 }
  0x14   :  { %v86_v5 = vld [vmem:[%s204_s2] ss:$0 sm:$0xff]  ;;  %v88_v14 = vld [vmem:[%s204_s2 + $0x1] ss:$0 sm:$0xff]  ;;  %s113_s6 = scalar_lea.vmem %s77_s5, 128  ;;  %p118_p9 = scmp.lt.s32.totalorder %s77_s5, %s77_s5 }
  0x15   :  { %p114_p8 = scmp.ne.s32.totalorder %s77_s5, %s113_s6  ;;  %p119_p10 = scmp.lt.s32.totalorder %s113_s6, %s113_s6 }
  0x17   :  { %p120_p11 = por %p119_p10, %p118_p9 }
  0x19   :  { %p121_p12 = pnand %p120_p11, %p114_p8 }
  0x1a   :  { %v31_v2 = vld [vmem:[#allocation5] sm:$0xff] }
  0x1b   :  { %v38_v3 = vmul.f32 %v85_v1, %v31_v2 }
  0x1d   :  { %v39_v4 = vsel %vm28_vm0, %v38_v3, 0.0 }
  0x1e   :  { %40 = vadd.xlane.f32.xlu0 %v39_v4 }
  0xab   :  { %v41_v6 = vpop.xlane.xlu0 %40 }
  0xac   :  { %v42_v7 = vmul.f32 %v41_v6, %v27_v0 }
  0xae   :  { %v47_v8 = vadd.f32 %v86_v5, %v42_v7 }
  0xb0   :  { %v48_v9 = vadd.f32 %v47_v8, %v31_v2 }
  0xb2   :  { %49 = vst.msk [vmem:[#allocation5] sm:$0xff] %vm28_vm0, %v48_v9 }
  0xb9   :  { %v51_v11 = vld [vmem:[#allocation5] sm:$0xff] }
  0xba   :  { %v58_v12 = vmul.f32 %v87_v10, %v51_v11 }
  0xbc   :  { %v59_v13 = vsel %vm28_vm0, %v58_v12, 0.0 }
  0xbd   :  { %60 = vadd.xlane.f32.xlu0 %v59_v13 }
 0x14a   :  { %v61_v15 = vpop.xlane.xlu0 %60 }
 0x14b   :  { %v62_v16 = vmul.f32 %v61_v15, %v27_v0 }
 0x14d   :  { %v67_v17 = vadd.f32 %v88_v14, %v62_v16 }
 0x14f   :  { %v68_v18 = vadd.f32 %v67_v17, %v51_v11 }
 0x151   :  { %69 = vst.msk [vmem:[#allocation5] sm:$0xff] %vm28_vm0, %v68_v18 }
 0x152   :  { %124 = shalt.err (!%p121_p12)
}
 0x153   :  { %s125_s2 = scalar_lea.hbm %s205_s3, 128 }
 0x154   :  { %p126_p13 = scmp.ne.s32.totalorder %s205_s3, %s125_s2  ;;  %p129_p0 = scmp.lt.u32.totalorder %s125_s2, %s205_s3 }
 0x156   :  { %p131_p1 = pnand %p129_p0, %p126_p13 }
 0x158   :  { %134 = shalt.err (!%p131_p1)
}
 0x159   :  { %79 = dma.vmem_to_hbm [thread:$0]  %s77_s5, 128, %s205_s3, [#allocation4]  }
 0x15a   :  { %137 = dma.done.wait [#allocation4], 128  }
 0x15b   :  { %138 = vsyncadd [#allocation4], 4294967168 }
 0x15c   :  { %83 = vsyncpa [#allocation3], 1 }
 0x15d   :  { %84 = vsyncpa [#allocation4], 1 }

</bundles_post_ra>
